<compile_context>
chip_gen: v7x
topology: tpu7x:2x2x1
jax: 0.10.0
libtpu: 0.0.40
codegen_flags: <defaults>
</compile_context>

<pallas_src>
import jax
import jax.numpy as jnp
from jax import lax
from jax.experimental import pallas as pl
from jax.experimental.pallas import tpu as pltpu


_LANE = 512              # lane width of the flattened slab (multiple of 128)
_MAX_BLOCK_ROWS = 1024   # up to 1024 x 512 x f32 = 2 MiB per tile buffer


def _mixture(x, a0, c_pos, c_neg, c_hs):
    """Fused x*a0 + relu(x)*a1 + prelu(x)*a2 + hardswish(x)*a3."""
    sel = jnp.where(x >= 0.0, c_pos, c_neg)          # a1+a2 (x>=0) / pw*a2 (x<0)
    hs = jnp.clip(x + 3.0, 0.0, 6.0) * c_hs          # hardswish factor * a3/6
    return x * (a0 + sel + hs)


def _stats_kernel(p_ref, x_ref, acc_ref):
    # p_ref  : SMEM (4,)  [a0, a1+a2, pw*a2, a3/6]
    # x_ref  : VMEM (block_rows, LANE) input tile
    # acc_ref: VMEM (2, LANE) resident accumulator (row 0 = sum, row 1 = sum of squares)
    @pl.when(pl.program_id(0) == 0)
    def _():
        acc_ref[...] = jnp.zeros_like(acc_ref)

    y = _mixture(x_ref[...], p_ref[0], p_ref[1], p_ref[2], p_ref[3])
    acc_ref[0:1, :] += jnp.sum(y, axis=0, keepdims=True)
    acc_ref[1:2, :] += jnp.sum(y * y, axis=0, keepdims=True)


def _apply_kernel(p_ref, x_ref, o_ref):
    # p_ref: SMEM (5,) BN-folded coefficients
    #        [a0*s, (a1+a2)*s, pw*a2*s, (a3/6)*s, beta - mean*s]
    y_scaled = _mixture(x_ref[...], p_ref[0], p_ref[1], p_ref[2], p_ref[3])
    o_ref[...] = y_scaled + p_ref[4]


def repact_bn_forward(x, actor_atn, prelu_w, bn_gamma, bn_beta, bn_eps=1e-5):
    orig_shape = x.shape
    x_flat = x.reshape(-1).astype(jnp.float32)
    n = x_flat.shape[0]                       # static python int

    rows = -(-n // _LANE)
    block_rows = min(_MAX_BLOCK_ROWS, ((rows + 7) // 8) * 8)
    num_tiles = -(-rows // block_rows)
    padded_rows = num_tiles * block_rows
    pad = padded_rows * _LANE - n
    if pad:
        x_flat = jnp.pad(x_flat, (0, pad))    # zero pad: y(0)=0, sums unaffected
    x2 = x_flat.reshape(padded_rows, _LANE)

    atn = jnp.asarray(actor_atn, jnp.float32).reshape(4)
    pw = jnp.asarray(prelu_w, jnp.float32).reshape(())
    a0, a1, a2, a3 = atn[0], atn[1], atn[2], atn[3]
    c_pos = a1 + a2
    c_neg = pw * a2
    c_hs = a3 * (1.0 / 6.0)

    # ---- pass A: global sum / sum-of-squares of the activation mixture ----
    acc = pl.pallas_call(
        _stats_kernel,
        out_shape=jax.ShapeDtypeStruct((2, _LANE), jnp.float32),
        grid=(num_tiles,),
        in_specs=[
            pl.BlockSpec(memory_space=pltpu.MemorySpace.SMEM),            # scalars
            pl.BlockSpec((block_rows, _LANE), lambda i: (i, 0)),          # x tile
        ],
        out_specs=pl.BlockSpec((2, _LANE), lambda i: (0, 0)),             # resident acc
        compiler_params=pltpu.CompilerParams(
            dimension_semantics=("arbitrary",),
            vmem_limit_bytes=32 * 1024 * 1024),
    )(jnp.stack([a0, c_pos, c_neg, c_hs]), x2)

    # ---- tiny scalar glue (plain XLA): batch statistics + folded BN affine ----
    inv_n = 1.0 / float(n)                    # exact trace-time constant
    mean = jnp.sum(acc[0]) * inv_n
    var = jnp.maximum(jnp.sum(acc[1]) * inv_n - mean * mean, 0.0)
    gamma = jnp.asarray(bn_gamma, jnp.float32)
    beta = jnp.asarray(bn_beta, jnp.float32)
    scale = gamma * lax.rsqrt(var + jnp.float32(bn_eps))
    bias = beta - mean * scale
    apply_p = jnp.stack([a0 * scale, c_pos * scale, c_neg * scale,
                         c_hs * scale, bias])

    # ---- pass B: recompute mixture, apply folded BatchNorm affine ----
    out2 = pl.pallas_call(
        _apply_kernel,
        out_shape=jax.ShapeDtypeStruct((padded_rows, _LANE), jnp.float32),
        grid=(num_tiles,),
        in_specs=[
            pl.BlockSpec(memory_space=pltpu.MemorySpace.SMEM),            # scalars
            pl.BlockSpec((block_rows, _LANE), lambda i: (i, 0)),          # x tile
        ],
        out_specs=pl.BlockSpec((block_rows, _LANE), lambda i: (i, 0)),
        compiler_params=pltpu.CompilerParams(
            dimension_semantics=("parallel",),
            vmem_limit_bytes=32 * 1024 * 1024),
    )(apply_p, x2)

    out_flat = out2.reshape(-1)
    if pad:
        out_flat = out_flat[:n]
    return out_flat.reshape(orig_shape)


def _reference_forward(x, actor_atn, prelu_w, bn_gamma, bn_beta, bn_eps=1e-5):
    # Pure-JAX reference mirroring the PyTorch module (train-mode BN).
    a0, a1, a2, a3 = actor_atn[0], actor_atn[1], actor_atn[2], actor_atn[3]
    y = (
        x * a0
        + jnp.maximum(x, 0.0) * a1
        + jnp.where(x >= 0.0, x, prelu_w * x) * a2
        + x * jnp.clip(x + 3.0, 0.0, 6.0) / 6.0 * a3
    )
    mean = jnp.mean(y)
    var = jnp.mean((y - mean) ** 2)
    return (y - mean) / jnp.sqrt(var + bn_eps) * bn_gamma + bn_beta


if __name__ == "__main__":
    key = jax.random.PRNGKey(0)
    B, C, H, W = 2, 4, 16, 16
    x = jax.random.normal(key, (B, C, H, W), dtype=jnp.float32) * 3.0

    # Deterministic parameters from the module's __init__ / randomBNInit:
    actor_atn = (jnp.zeros(4, jnp.float32) + 1.0 / 4.0) * 5.0   # -> [1.25]*4
    prelu_w = jnp.float32(0.25)                                  # PReLU default slope
    bn_gamma = jnp.float32(1.3254)
    bn_beta = jnp.float32(1.2524)
    bn_eps = 1e-5
    # TODO(synk): train-mode BN also updates running_mean/running_var buffers; only
    # the forward output is produced here (eval mode would use 0.7254 / 1.7242).

    fwd = jax.jit(repact_bn_forward)
    out = jax.block_until_ready(fwd(x, actor_atn, prelu_w, bn_gamma, bn_beta, bn_eps))

    ref = _reference_forward(x, actor_atn, prelu_w, bn_gamma, bn_beta, bn_eps)
    assert out.shape == (B, C, H, W)
    assert jnp.allclose(out, ref, atol=5e-4, rtol=5e-4), "kernel mismatch vs reference"

    print("KERNEL_OK")
</pallas_src>

<mosaic_0001>
module attributes {stable_mosaic.version = 11 : i64} {
  func.func @_stats_kernel(%arg0: i32, %arg1: memref<4xf32, #tpu.memory_space<smem>>, %arg2: memref<8x512xf32, #tpu.memory_space<vmem>>, %arg3: memref<2x512xf32, #tpu.memory_space<vmem>>) attributes {dimension_semantics = [#tpu.dimension_semantics<arbitrary>], iteration_bounds = array<i64: 1>, scalar_prefetch = 0 : i64, scratch_operands = 0 : i64, tpu.core_type = #tpu.core_type<tc>, window_params = [{transform_indices = @transform_0, window_bounds = array<i64: 4>}, {transform_indices = @transform_1, window_bounds = array<i64: 8, 512>}, {pipeline_mode = #tpu.pipeline_mode<synchronous>, transform_indices = @transform_2, window_bounds = array<i64: 2, 512>}]} {
    %c0_i32 = arith.constant 0 : i32
    %0 = arith.cmpi eq, %arg0, %c0_i32 : i32
    %1 = arith.extui %0 : i1 to i32
    %c0_i32_0 = arith.constant 0 : i32
    %2 = arith.cmpi ne, %1, %c0_i32_0 : i32
    scf.if %2 {
      %cst_16 = arith.constant 0.000000e+00 : f32
      %36 = vector.broadcast %cst_16 : f32 to vector<2x512xf32>
      %c0_17 = arith.constant 0 : index
      %c0_18 = arith.constant 0 : index
      %37 = vector.load %arg3[%c0_17, %c0_18] : memref<2x512xf32, #tpu.memory_space<vmem>>, vector<2x512xf32>
      tpu.vector_store %arg3[%c0_17, %c0_18], %36 {strides = array<i32>} : memref<2x512xf32, #tpu.memory_space<vmem>>, vector<2x512xf32>,
    } else {
    }
    %c0 = arith.constant 0 : index
    %c0_1 = arith.constant 0 : index
    %3 = vector.load %arg2[%c0, %c0_1] : memref<8x512xf32, #tpu.memory_space<vmem>>, vector<8x512xf32>
    %c0_2 = arith.constant 0 : index
    %4 = memref.load %arg1[%c0_2] : memref<4xf32, #tpu.memory_space<smem>>
    %c1 = arith.constant 1 : index
    %5 = memref.load %arg1[%c1] : memref<4xf32, #tpu.memory_space<smem>>
    %c2 = arith.constant 2 : index
    %6 = memref.load %arg1[%c2] : memref<4xf32, #tpu.memory_space<smem>>
    %c3 = arith.constant 3 : index
    %7 = memref.load %arg1[%c3] : memref<4xf32, #tpu.memory_space<smem>>
    %cst = arith.constant 0.000000e+00 : f32
    %8 = vector.broadcast %cst : f32 to vector<8x512xf32>
    %9 = arith.cmpf oge, %3, %8 : vector<8x512xf32>
    %10 = vector.broadcast %5 : f32 to vector<8x512xf32>
    %11 = vector.broadcast %6 : f32 to vector<8x512xf32>
    %12 = arith.select %9, %10, %11 : vector<8x512xi1>, vector<8x512xf32>
    %cst_3 = arith.constant 3.000000e+00 : f32
    %13 = vector.broadcast %cst_3 : f32 to vector<8x512xf32>
    %14 = arith.addf %3, %13 : vector<8x512xf32>
    %cst_4 = arith.constant 0.000000e+00 : f32
    %cst_5 = arith.constant 6.000000e+00 : f32
    %15 = vector.broadcast %cst_4 : f32 to vector<8x512xf32>
    %16 = arith.maximumf %15, %14 : vector<8x512xf32>
    %17 = vector.broadcast %cst_5 : f32 to vector<8x512xf32>
    %18 = arith.minimumf %17, %16 : vector<8x512xf32>
    %19 = vector.broadcast %7 : f32 to vector<8x512xf32>
    %20 = arith.mulf %18, %19 : vector<8x512xf32>
    %21 = vector.broadcast %4 : f32 to vector<8x512xf32>
    %22 = arith.addf %21, %12 : vector<8x512xf32>
    %23 = arith.addf %22, %20 : vector<8x512xf32>
    %24 = arith.mulf %3, %23 : vector<8x512xf32>
    %c0_6 = arith.constant 0 : index
    %c0_7 = arith.constant 0 : index
    %25 = vector.load %arg3[%c0_6, %c0_7] : memref<2x512xf32, #tpu.memory_space<vmem>>, vector<1x512xf32>
    %cst_8 = arith.constant dense<0.000000e+00> : vector<512xf32>
    %26 = vector.multi_reduction <add>, %24, %cst_8 [0] : vector<8x512xf32> to vector<512xf32>
    %27 = vector.shape_cast %26 : vector<512xf32> to vector<1x512xf32>
    %28 = arith.addf %25, %27 : vector<1x512xf32>
    %c0_9 = arith.constant 0 : index
    %c0_10 = arith.constant 0 : index
    %29 = vector.load %arg3[%c0_9, %c0_10] : memref<2x512xf32, #tpu.memory_space<vmem>>, vector<1x512xf32>
    tpu.vector_store %arg3[%c0_9, %c0_10], %28 {strides = array<i32>} : memref<2x512xf32, #tpu.memory_space<vmem>>, vector<1x512xf32>,
    %c1_11 = arith.constant 1 : index
    %c0_12 = arith.constant 0 : index
    %30 = vector.load %arg3[%c1_11, %c0_12] : memref<2x512xf32, #tpu.memory_space<vmem>>, vector<1x512xf32>
    %31 = arith.mulf %24, %24 : vector<8x512xf32>
    %cst_13 = arith.constant dense<0.000000e+00> : vector<512xf32>
    %32 = vector.multi_reduction <add>, %31, %cst_13 [0] : vector<8x512xf32> to vector<512xf32>
    %33 = vector.shape_cast %32 : vector<512xf32> to vector<1x512xf32>
    %34 = arith.addf %30, %33 : vector<1x512xf32>
    %c1_14 = arith.constant 1 : index
    %c0_15 = arith.constant 0 : index
    %35 = vector.load %arg3[%c1_14, %c0_15] : memref<2x512xf32, #tpu.memory_space<vmem>>, vector<1x512xf32>
    tpu.vector_store %arg3[%c1_14, %c0_15], %34 {strides = array<i32>} : memref<2x512xf32, #tpu.memory_space<vmem>>, vector<1x512xf32>,
    return
  }
  func.func @transform_0(%arg0: i32) -> i32 {
    %c0_i32 = arith.constant 0 : i32
    %c0_i32_0 = arith.constant 0 : i32
    return %c0_i32 : i32
  }
  func.func @transform_1(%arg0: i32) -> (i32, i32) {
    %c0_i32 = arith.constant 0 : i32
    %c0_i32_0 = arith.constant 0 : i32
    return %arg0, %c0_i32 : i32, i32
  }
  func.func @transform_2(%arg0: i32) -> (i32, i32) {
    %c0_i32 = arith.constant 0 : i32
    %c0_i32_0 = arith.constant 0 : i32
    %c0_i32_1 = arith.constant 0 : i32
    return %c0_i32, %c0_i32_0 : i32, i32
  }
}

module attributes {stable_mosaic.version = 11 : i64} {
  func.func @_apply_kernel(%arg0: i32, %arg1: memref<5xf32, #tpu.memory_space<smem>>, %arg2: memref<8x512xf32, #tpu.memory_space<vmem>>, %arg3: memref<8x512xf32, #tpu.memory_space<vmem>>) attributes {dimension_semantics = [#tpu.dimension_semantics<parallel>], iteration_bounds = array<i64: 1>, scalar_prefetch = 0 : i64, scratch_operands = 0 : i64, tpu.core_type = #tpu.core_type<tc>, window_params = [{transform_indices = @transform_0, window_bounds = array<i64: 5>}, {transform_indices = @transform_1, window_bounds = array<i64: 8, 512>}, {transform_indices = @transform_2, window_bounds = array<i64: 8, 512>}]} {
    %c0 = arith.constant 0 : index
    %c0_0 = arith.constant 0 : index
    %0 = vector.load %arg2[%c0, %c0_0] : memref<8x512xf32, #tpu.memory_space<vmem>>, vector<8x512xf32>
    %c0_1 = arith.constant 0 : index
    %1 = memref.load %arg1[%c0_1] : memref<5xf32, #tpu.memory_space<smem>>
    %c1 = arith.constant 1 : index
    %2 = memref.load %arg1[%c1] : memref<5xf32, #tpu.memory_space<smem>>
    %c2 = arith.constant 2 : index
    %3 = memref.load %arg1[%c2] : memref<5xf32, #tpu.memory_space<smem>>
    %c3 = arith.constant 3 : index
    %4 = memref.load %arg1[%c3] : memref<5xf32, #tpu.memory_space<smem>>
    %cst = arith.constant 0.000000e+00 : f32
    %5 = vector.broadcast %cst : f32 to vector<8x512xf32>
    %6 = arith.cmpf oge, %0, %5 : vector<8x512xf32>
    %7 = vector.broadcast %2 : f32 to vector<8x512xf32>
    %8 = vector.broadcast %3 : f32 to vector<8x512xf32>
    %9 = arith.select %6, %7, %8 : vector<8x512xi1>, vector<8x512xf32>
    %cst_2 = arith.constant 3.000000e+00 : f32
    %10 = vector.broadcast %cst_2 : f32 to vector<8x512xf32>
    %11 = arith.addf %0, %10 : vector<8x512xf32>
    %cst_3 = arith.constant 0.000000e+00 : f32
    %cst_4 = arith.constant 6.000000e+00 : f32
    %12 = vector.broadcast %cst_3 : f32 to vector<8x512xf32>
    %13 = arith.maximumf %12, %11 : vector<8x512xf32>
    %14 = vector.broadcast %cst_4 : f32 to vector<8x512xf32>
    %15 = arith.minimumf %14, %13 : vector<8x512xf32>
    %16 = vector.broadcast %4 : f32 to vector<8x512xf32>
    %17 = arith.mulf %15, %16 : vector<8x512xf32>
    %18 = vector.broadcast %1 : f32 to vector<8x512xf32>
    %19 = arith.addf %18, %9 : vector<8x512xf32>
    %20 = arith.addf %19, %17 : vector<8x512xf32>
    %21 = arith.mulf %0, %20 : vector<8x512xf32>
    %c4 = arith.constant 4 : index
    %22 = memref.load %arg1[%c4] : memref<5xf32, #tpu.memory_space<smem>>
    %23 = vector.broadcast %22 : f32 to vector<8x512xf32>
    %24 = arith.addf %21, %23 : vector<8x512xf32>
    %c0_5 = arith.constant 0 : index
    %c0_6 = arith.constant 0 : index
    %25 = vector.load %arg3[%c0_5, %c0_6] : memref<8x512xf32, #tpu.memory_space<vmem>>, vector<8x512xf32>
    tpu.vector_store %arg3[%c0_5, %c0_6], %24 {strides = array<i32>} : memref<8x512xf32, #tpu.memory_space<vmem>>, vector<8x512xf32>,
    return
  }
  func.func @transform_0(%arg0: i32) -> i32 {
    %c0_i32 = arith.constant 0 : i32
    %c0_i32_0 = arith.constant 0 : i32
    return %c0_i32 : i32
  }
  func.func @transform_1(%arg0: i32) -> (i32, i32) {
    %c0_i32 = arith.constant 0 : i32
    %c0_i32_0 = arith.constant 0 : i32
    return %arg0, %c0_i32 : i32, i32
  }
  func.func @transform_2(%arg0: i32) -> (i32, i32) {
    %c0_i32 = arith.constant 0 : i32
    %c0_i32_0 = arith.constant 0 : i32
    return %arg0, %c0_i32 : i32, i32
  }
}

</mosaic_0001>

<bundles_post_ra>
// kernel: repact_bn_forward.2
= control target key start
LH: loop header
LB: loop body
LE: loop exit
PB: predicated region body
PF: predicated region fallthrough
CT: control target
= control target key end

     0   :  { %7 = vsyncpa [#allocation3], 0  ;;  %s287_s0 = inlined_call_operand.vmem [shape: f32[4], index: 0, kind: input, shape index: {}]   ;;  %s288_s1 = inlined_call_operand.vmem [shape: f32[8,512], index: 1, kind: input, shape index: {}]   ;;  %s289_s2 = inlined_call_operand.vmem [shape: f32[2,512], index: 2, kind: output, shape index: {}]  }
   0x1   :  { %s14_s11 = sshll.u32 %s287_s0, 4  ;;  %s15_s11 = int_to_ptr.vmem [resolvable:$true] %s14_s11 }
   0x2   :  { %s211_s12 = scalar_lea.vmem %s15_s11, 16  ;;  %p216_p1 = scmp.lt.s32.totalorder %s15_s11, %s15_s11 }
   0x3   :  { %p212_p0 = scmp.ne.s32.totalorder %s15_s11, %s211_s12  ;;  %p217_p2 = scmp.lt.s32.totalorder %s211_s12, %s211_s12 }
   0x5   :  { %p218_p3 = por %p217_p2, %p216_p1 }
   0x7   :  { %p219_p4 = pnand %p218_p3, %p212_p0 }
   0x9   :  { %222 = shalt.err (!%p219_p4)
}
   0xa   :  { %s225_s13 = smov [#allocation2]  }
   0xb   :  { %17 = dma.vmem_to_smem %s15_s11, 16, %s225_s13, [#allocation3]  }
   0xc   :  { %223 = dma.done.wait [#allocation3], 16  }
   0xd   :  { %224 = vsyncadd [#allocation3], 4294967280 }
   0xe   :  { %23 = sfence }
   0xf   :  { %v29_v0 = vld [vmem:[%s288_s1] sm:$0xff]  ;;  %v30_v1 = vld [vmem:[%s288_s1 + $0x8] sm:$0xff]  ;;  %v31_v2 = vld [vmem:[%s288_s1 + $0x10] sm:$0xff]  ;;  %s33_s19 = sld [smem:[#allocation2]]  ;;  %v226_v3 = vmov 0.0   ;;  %s203_s24 = sld [smem:[#allocation2 + $0x1]]  ;;  %v111_v17 = vlaneseq }
  0x10   :  { %28 = vst [vmem:[%s289_s2] sm:$0xff] %v226_v3  ;;  %v32_v4 = vld [vmem:[%s288_s1 + $0x18] sm:$0xff]  ;;  %s204_s25 = sld [smem:[#allocation2 + $0x2]]  ;;  %s205_s26 = sld [smem:[#allocation2 + $0x3]]  ;;  %v47_v5 = vadd.f32 3.0, %v29_v0  ;;  %v48_v6 = vadd.f32 3.0, %v30_v1  ;;  %v49_v7 = vadd.f32 3.0, %v31_v2 }
  0x11   :  { %v50_v8 = vadd.f32 3.0, %v32_v4  ;;  %vm37_vm0 = vcmp.ge.f32.partialorder %v29_v0, 0.0  ;;  %vm38_vm1 = vcmp.ge.f32.partialorder %v30_v1, 0.0  ;;  %vm39_vm2 = vcmp.ge.f32.partialorder %v31_v2, 0.0 }
  0x12   :  { %v51_v9 = vmax.f32 %v47_v5, 0.0  ;;  %vm40_vm3 = vcmp.ge.f32.partialorder %v32_v4, 0.0  ;;  %v52_v10 = vmax.f32 %v48_v6, 0.0  ;;  %v53_v11 = vmax.f32 %v49_v7, 0.0 }
  0x13   :  { %v54_v12 = vmax.f32 %v50_v8, 0.0  ;;  %v227_v15 = vmov 1966171168   ;;  %v112_v37 = vshrl.u32 %v111_v17, 7  ;;  %vm134_vm4 = vcmp.lt.s32.totalorder %v111_v17, 512 }
  0x14   :  { %v55_v13 = vmin.f32 %v51_v9, 6.0  ;;  %v109_v16 = vunpack.c.l.s4 %v227_v15  ;;  %v56_v20 = vmin.f32 %v52_v10, 6.0  ;;  %v57_v21 = vmin.f32 %v53_v11, 6.0 }
  0x15   :  { %v64_v14 = vstv %s33_s19  ;;  %v41_v18 = vstv %s203_s24  ;;  %v58_v26 = vmin.f32 %v54_v12, 6.0 }
  0x16   :  { %v42_v19 = vstv %s204_s25  ;;  %v59_v27 = vstv %s205_s26  ;;  %v110_v36 = vunpack.c.0.s8 %v109_v16 }
  0x17   :  { %v43_v22 = vsel %vm37_vm0, %v41_v18, %v42_v19  ;;  %v44_v23 = vsel %vm38_vm1, %v41_v18, %v42_v19  ;;  %v45_v24 = vsel %vm39_vm2, %v41_v18, %v42_v19  ;;  %v46_v25 = vsel %vm40_vm3, %v41_v18, %v42_v19 }
  0x18   :  { %v65_v28 = vadd.f32 %v64_v14, %v43_v22  ;;  %v66_v29 = vadd.f32 %v64_v14, %v44_v23  ;;  %v60_v30 = vmul.f32 %v59_v27, %v55_v13  ;;  %v61_v31 = vmul.f32 %v59_v27, %v56_v20 }
  0x19   :  { %v62_v32 = vmul.f32 %v59_v27, %v57_v21  ;;  %v67_v33 = vadd.f32 %v64_v14, %v45_v24  ;;  %v63_v34 = vmul.f32 %v59_v27, %v58_v26  ;;  %v68_v35 = vadd.f32 %v64_v14, %v46_v25 }
  0x1a   :  { %v69_v38 = vadd.f32 %v65_v28, %v60_v30  ;;  %v70_v39 = vadd.f32 %v66_v29, %v61_v31  ;;  %v266_v46 = vsub.s32 %v110_v36, %v112_v37 }
  0x1b   :  { %v71_v40 = vadd.f32 %v67_v33, %v62_v32  ;;  %v72_v41 = vadd.f32 %v68_v35, %v63_v34 }
  0x1c   :  { %v73_v42 = vmul.f32 %v69_v38, %v29_v0  ;;  %v74_v43 = vmul.f32 %v70_v39, %v30_v1 }
  0x1d   :  { %v75_v44 = vmul.f32 %v71_v40, %v31_v2  ;;  %v76_v45 = vmul.f32 %v72_v41, %v32_v4 }
  0x1e   :  { %v78_v47 = vrot.slane %v73_v42, 4  ;;  %v84_v48 = vrot.slane %v74_v43, 4  ;;  %v139_v50 = vmul.f32 %v73_v42, %v73_v42  ;;  %v140_v52 = vmul.f32 %v74_v43, %v74_v43 }
  0x1f   :  { %v90_v49 = vrot.slane %v75_v44, 4  ;;  %v96_v51 = vrot.slane %v76_v45, 4  ;;  %v141_v53 = vmul.f32 %v75_v44, %v75_v44  ;;  %v142_v54 = vmul.f32 %v76_v45, %v76_v45 }
  0x20   :  { %v79_v55 = vadd.f32 %v78_v47, %v73_v42  ;;  %v85_v56 = vadd.f32 %v84_v48, %v74_v43  ;;  %v143_v58 = vrot.slane %v139_v50, 4  ;;  %v149_v60 = vrot.slane %v140_v52, 4 }
  0x21   :  { %v91_v57 = vadd.f32 %v90_v49, %v75_v44  ;;  %v97_v59 = vadd.f32 %v96_v51, %v76_v45  ;;  %v155_v61 = vrot.slane %v141_v53, 4  ;;  %v161_v62 = vrot.slane %v142_v54, 4  ;;  %v77_v45 = vld [vmem:[%s289_s2] ss:$2 sm:$0xf] }
  0x22   :  { %v80_v63 = vrot.slane %v79_v55, 2  ;;  %v86_v0 = vrot.slane %v85_v56, 2  ;;  %v144_v2 = vadd.f32 %v143_v58, %v139_v50  ;;  %v150_v4 = vadd.f32 %v149_v60, %v140_v52  ;;  %v206_v49 = vld [vmem:[%s289_s2 + $0x1] ss:$2 sm:$0xf] }
  0x23   :  { %v92_v1 = vrot.slane %v91_v57, 2  ;;  %v98_v3 = vrot.slane %v97_v59, 2  ;;  %v156_v5 = vadd.f32 %v155_v61, %v141_v53  ;;  %v162_v6 = vadd.f32 %v161_v62, %v142_v54 }
  0x24   :  { %v81_v7 = vadd.f32 %v80_v63, %v79_v55  ;;  %v87_v8 = vadd.f32 %v86_v0, %v85_v56  ;;  %v145_v10 = vrot.slane %v144_v2, 2  ;;  %v151_v12 = vrot.slane %v150_v4, 2 }
  0x25   :  { %v93_v9 = vadd.f32 %v92_v1, %v91_v57  ;;  %v99_v11 = vadd.f32 %v98_v3, %v97_v59  ;;  %v157_v13 = vrot.slane %v156_v5, 2  ;;  %v163_v14 = vrot.slane %v162_v6, 2 }
  0x26   :  { %v82_v15 = vrot.slane %v81_v7, 1  ;;  %v88_v16 = vrot.slane %v87_v8, 1  ;;  %v146_v19 = vadd.f32 %v145_v10, %v144_v2  ;;  %v152_v21 = vadd.f32 %v151_v12, %v150_v4 }
  0x27   :  { %v94_v18 = vrot.slane %v93_v9, 1  ;;  %v100_v20 = vrot.slane %v99_v11, 1  ;;  %v158_v22 = vadd.f32 %v157_v13, %v156_v5  ;;  %v164_v23 = vadd.f32 %v163_v14, %v162_v6 }
  0x28   :  { %v83_v24 = vadd.f32 %v82_v15, %v81_v7  ;;  %v89_v25 = vadd.f32 %v88_v16, %v87_v8  ;;  %v147_v27 = vrot.slane %v146_v19, 1  ;;  %v153_v29 = vrot.slane %v152_v21, 1 }
  0x29   :  { %v95_v26 = vadd.f32 %v94_v18, %v93_v9  ;;  %v101_v28 = vadd.f32 %v100_v20, %v99_v11  ;;  %v159_v30 = vrot.slane %v158_v22, 1  ;;  %v165_v31 = vrot.slane %v164_v23, 1 }
  0x2a   :  { %v106_v32 = vcombine.low %v83_v24, %v89_v25  ;;  %v148_v33 = vadd.f32 %v147_v27, %v146_v19  ;;  %v154_v35 = vadd.f32 %v153_v29, %v152_v21 }
  0x2b   :  { %v107_v34 = vcombine.low %v95_v26, %v101_v28  ;;  %v160_v36 = vadd.f32 %v159_v30, %v158_v22  ;;  %v166_v37 = vadd.f32 %v165_v31, %v164_v23 }
  0x2c   :  { %v114_v38 = vrot.slane %v106_v32, %v266_v46  ;;  %v171_v40 = vcombine.low %v148_v33, %v154_v35 }
  0x2d   :  { %v121_v39 = vrot.slane %v107_v34, %v266_v46  ;;  %v172_v41 = vcombine.low %v160_v36, %v166_v37 }
  0x2e   :  { %v179_v43 = vrot.slane %v171_v40, %v266_v46 }
  0x2f   :  { %v122_v42 = vcombine.low %v114_v38, %v121_v39  ;;  %v186_v44 = vrot.slane %v172_v41, %v266_v46 }
  0x31   :  { %v129_v47 = vrot.slane %v122_v42, %v266_v46  ;;  %v187_v48 = vcombine.low %v179_v43, %v186_v44 }
  0x33   :  { %v131_v50 = vadd.f32 %v129_v47, %v77_v45  ;;  %v194_v51 = vrot.slane %v187_v48, %v266_v46 }
  0x35   :  { %136 = vst.msk [vmem:[%s289_s2] ss:$2 sm:$0xf] %vm134_vm4, %v131_v50  ;;  %v196_v52 = vadd.f32 %v206_v49, %v194_v51 }
  0x37   :  { %207 = vst.msk [vmem:[%s289_s2 + $0x1] ss:$2 sm:$0xf] %vm134_vm4, %v196_v52 }
  0x38   :  { %202 = vsyncpa [#allocation3], 1 }

// kernel: repact_bn_forward.3
= control target key start
LH: loop header
LB: loop body
LE: loop exit
PB: predicated region body
PF: predicated region fallthrough
CT: control target
= control target key end

     0   :  { %7 = vsyncpa [#allocation3], 0  ;;  %s151_s0 = inlined_call_operand.vmem [shape: f32[5], index: 0, kind: input, shape index: {}]   ;;  %s152_s1 = inlined_call_operand.vmem [shape: f32[8,512], index: 1, kind: input, shape index: {}]   ;;  %s153_s2 = inlined_call_operand.vmem [shape: f32[8,512], index: 2, kind: output, shape index: {}]  }
   0x1   :  { %s14_s11 = sshll.u32 %s151_s0, 4  ;;  %s15_s11 = int_to_ptr.vmem [resolvable:$true] %s14_s11 }
   0x2   :  { %s92_s12 = scalar_lea.vmem %s15_s11, 16  ;;  %p97_p1 = scmp.lt.s32.totalorder %s15_s11, %s15_s11 }
   0x3   :  { %p93_p0 = scmp.ne.s32.totalorder %s15_s11, %s92_s12  ;;  %p98_p2 = scmp.lt.s32.totalorder %s92_s12, %s92_s12 }
   0x5   :  { %p99_p3 = por %p98_p2, %p97_p1 }
   0x7   :  { %p100_p4 = pnand %p99_p3, %p93_p0 }
   0x9   :  { %103 = shalt.err (!%p100_p4)
}
   0xa   :  { %s106_s13 = smov [#allocation2]  }
   0xb   :  { %17 = dma.vmem_to_smem %s15_s11, 16, %s106_s13, [#allocation3]  }
   0xc   :  { %104 = dma.done.wait [#allocation3], 16  }
   0xd   :  { %105 = vsyncadd [#allocation3], 4294967280 }
   0xe   :  { %23 = sfence }
   0xf   :  { %v24_v0 = vld [vmem:[%s152_s1] sm:$0xff]  ;;  %s28_s16 = sld [smem:[#allocation2]]  ;;  %s87_s17 = sld [smem:[#allocation2 + $0x1]]  ;;  %v25_v1 = vld [vmem:[%s152_s1 + $0x8] sm:$0xff]  ;;  %v26_v4 = vld [vmem:[%s152_s1 + $0x10] sm:$0xff] }
  0x10   :  { %s88_s19 = sld [smem:[#allocation2 + $0x2]]  ;;  %s89_s20 = sld [smem:[#allocation2 + $0x3]]  ;;  %v42_v2 = vadd.f32 3.0, %v24_v0  ;;  %v43_v3 = vadd.f32 3.0, %v25_v1  ;;  %v27_v5 = vld [vmem:[%s152_s1 + $0x18] sm:$0xff]  ;;  %v44_v7 = vadd.f32 3.0, %v26_v4 }
  0x11   :  { %vm32_vm0 = vcmp.ge.f32.partialorder %v24_v0, 0.0  ;;  %s90_s25 = sld [smem:[#allocation2 + $0x4]]  ;;  %v45_v9 = vadd.f32 3.0, %v27_v5  ;;  %vm33_vm1 = vcmp.ge.f32.partialorder %v25_v1, 0.0  ;;  %vm34_vm2 = vcmp.ge.f32.partialorder %v26_v4, 0.0 }
  0x12   :  { %v46_v6 = vmax.f32 %v42_v2, 0.0  ;;  %v47_v8 = vmax.f32 %v43_v3, 0.0  ;;  %v48_v11 = vmax.f32 %v44_v7, 0.0  ;;  %vm35_vm3 = vcmp.ge.f32.partialorder %v27_v5, 0.0 }
  0x13   :  { %v49_v15 = vmax.f32 %v45_v9, 0.0 }
  0x14   :  { %v50_v10 = vmin.f32 %v46_v6, 6.0  ;;  %v51_v14 = vmin.f32 %v47_v8, 6.0  ;;  %v52_v18 = vmin.f32 %v48_v11, 6.0 }
  0x15   :  { %v36_v12 = vstv %s87_s17  ;;  %v59_v13 = vstv %s28_s16  ;;  %v53_v29 = vmin.f32 %v49_v15, 6.0 }
  0x16   :  { %v37_v16 = vstv %s88_s19  ;;  %v54_v17 = vstv %s89_s20 }
  0x17   :  { %v38_v19 = vsel %vm32_vm0, %v36_v12, %v37_v16  ;;  %v55_v20 = vmul.f32 %v54_v17, %v50_v10  ;;  %v39_v21 = vsel %vm33_vm1, %v36_v12, %v37_v16  ;;  %v56_v23 = vmul.f32 %v54_v17, %v51_v14 }
  0x18   :  { %v60_v22 = vadd.f32 %v59_v13, %v38_v19  ;;  %v61_v24 = vadd.f32 %v59_v13, %v39_v21  ;;  %v40_v25 = vsel %vm34_vm2, %v36_v12, %v37_v16  ;;  %v57_v26 = vmul.f32 %v54_v17, %v52_v18 }
  0x19   :  { %v62_v27 = vadd.f32 %v59_v13, %v40_v25  ;;  %v41_v28 = vsel %vm35_vm3, %v36_v12, %v37_v16  ;;  %v73_v33 = vstv %s90_s25  ;;  %v58_v35 = vmul.f32 %v54_v17, %v53_v29 }
  0x1a   :  { %v64_v30 = vadd.f32 %v60_v22, %v55_v20  ;;  %v65_v31 = vadd.f32 %v61_v24, %v56_v23  ;;  %v63_v32 = vadd.f32 %v59_v13, %v41_v28 }
  0x1b   :  { %v66_v34 = vadd.f32 %v62_v27, %v57_v26 }
  0x1c   :  { %v68_v36 = vmul.f32 %v64_v30, %v24_v0  ;;  %v69_v37 = vmul.f32 %v65_v31, %v25_v1  ;;  %v67_v39 = vadd.f32 %v63_v32, %v58_v35 }
  0x1d   :  { %v70_v38 = vmul.f32 %v66_v34, %v26_v4 }
  0x1e   :  { %v74_v40 = vadd.f32 %v73_v33, %v68_v36  ;;  %v75_v41 = vadd.f32 %v73_v33, %v69_v37  ;;  %v71_v43 = vmul.f32 %v67_v39, %v27_v5 }
  0x1f   :  { %v76_v42 = vadd.f32 %v73_v33, %v70_v38 }
  0x20   :  { %78 = vst [vmem:[%s153_s2] sm:$0xff] %v74_v40  ;;  %79 = vst [vmem:[%s153_s2 + $0x8] sm:$0xff] %v75_v41  ;;  %v77_v44 = vadd.f32 %v73_v33, %v71_v43 }
  0x21   :  { %80 = vst [vmem:[%s153_s2 + $0x10] sm:$0xff] %v76_v42 }
  0x22   :  { %81 = vst [vmem:[%s153_s2 + $0x18] sm:$0xff] %v77_v44 }
  0x23   :  { %86 = vsyncpa [#allocation3], 1 }

</bundles_post_ra>
